<compile_context>
chip_gen: v7x
topology: tpu7x:2x2x1
jax: 0.10.0
libtpu: 0.0.40
codegen_flags: <defaults>
</compile_context>

<pallas_src>
import math
import functools

import jax
import jax.numpy as jnp
from jax.experimental import pallas as pl
from jax.experimental.pallas import tpu as pltpu


def _masked_layernorm(x, w, b, mask, inv_dim, eps):
    """LayerNorm over the real (unpadded) channel lanes.

    x: (rows, dim_p) with padded lanes == 0.  w/b/mask: (1, dim_p), zero on pads.
    """
    mu = jnp.sum(x, axis=-1, keepdims=True) * inv_dim
    xc = (x - mu) * mask
    var = jnp.sum(xc * xc, axis=-1, keepdims=True) * inv_dim
    return xc * jax.lax.rsqrt(var + eps) * w + b


def _cross_attn_kernel(
    x_ref,              # (1, Bt*N, dim_p) f32
    q_ref,              # (1, dim_p) f32   pre-projected, pre-normed, pre-scaled query
    nw_ref, nb_ref,     # (1, dim_p)       input LayerNorm
    wkvT_ref,           # (dim_p, 2*dim_p) bf16   [Wk^T | Wv^T]
    bkv_ref,            # (1, 2*dim_p) f32        [bk | bv]
    woT_ref,            # (dim_p, dim_p) bf16
    bo_ref,             # (1, dim_p) f32
    knw_ref, knb_ref,   # (1, dim_p)       k LayerNorm
    hm_ref,             # (H, dim_p)       head one-hot mask
    hmT_ref,            # (dim_p, H)       pre-transposed head mask
    mask_ref,           # (1, dim_p)       1.0 on real channel lanes, 0.0 on pads
    o_ref,              # (1, Bt, dim_p)
    *, eps, inv_dim, bt, n, dim_p,
):
    mask = mask_ref[...]
    x = x_ref[0]                                                     # (R, dim_p)

    # Input LayerNorm (f32, padded-lane aware).
    xn = _masked_layernorm(x, nw_ref[...], nb_ref[...], mask, inv_dim, eps)

    # Fused k/v projection: one wide MXU matmul, bf16 operands, f32 accumulate.
    kv = jnp.dot(xn.astype(jnp.bfloat16), wkvT_ref[...],
                 preferred_element_type=jnp.float32) + bkv_ref[...]  # (R, 2*dim_p)
    k = kv[:, :dim_p]
    v = kv[:, dim_p:]

    # k LayerNorm (q was normalized + scaled by 1/sqrt(head_dim) in the wrapper).
    k = _masked_layernorm(k, knw_ref[...], knb_ref[...], mask, inv_dim, eps)

    # Per-head scores: scores[r, h] = sum_{d in head h} q[d] * k[r, d]
    scores = jnp.dot(k * q_ref[...], hmT_ref[...],
                     preferred_element_type=jnp.float32)             # (R, H)

    # Softmax over the key axis (N), per batch element and head.
    num_heads = hm_ref.shape[0]
    s3 = scores.reshape(bt, n, num_heads)                            # (Bt, N, H)
    m = jnp.max(s3, axis=1, keepdims=True)                           # (Bt, 1, H)
    p = jnp.exp(s3 - m)
    denom = jnp.sum(p, axis=1, keepdims=True)                        # (Bt, 1, H)
    p = p * pl.reciprocal(denom, approx=True)                        # (Bt, N, H)

    # Expand per-head probs to full channel width, weight V, reduce over N.
    p_full = jnp.dot(p.reshape(bt * n, num_heads), hm_ref[...],
                     preferred_element_type=jnp.float32)             # (R, dim_p)
    attn = jnp.sum((p_full * v).reshape(bt, n, dim_p), axis=1)       # (Bt, dim_p)

    # Output projection (bf16 operands, f32 accumulate), lane-dense store.
    out = jnp.dot(attn.astype(jnp.bfloat16), woT_ref[...],
                  preferred_element_type=jnp.float32) + bo_ref[...]  # (Bt, dim_p)
    o_ref[0] = out.astype(o_ref.dtype)


def _pick_batch_tile(B, N, target_rows=256):
    """Smallest divisor Bt of B with Bt*N >= target_rows, keeping >=2 grid steps."""
    if N % 8 != 0:
        return 1  # keep in-kernel (R, dim) <-> (Bt, N, dim) reshapes sublane-aligned
    divisors = [d for d in range(1, B + 1) if B % d == 0]
    bt = None
    for d in divisors:
        if d * N >= target_rows:
            bt = d
            break
    if bt is None:
        bt = B
    if bt == B and B > 1:
        # keep at least 2 grid steps so the parallel batch axis can use both
        # TensorCores on v7x.
        bt = [d for d in divisors if d < B][-1]
    return bt


def discriminator_cross_attn_block(x, params, *, num_heads, eps=1e-6):
    B, N, dim = x.shape
    assert dim % num_heads == 0
    head_dim = dim // num_heads
    dim_p = ((dim + 127) // 128) * 128       # pad channels to full 128-lane vregs
    pad = dim_p - dim
    f32 = jnp.float32

    bt = _pick_batch_tile(B, N)
    nb = B // bt
    rows = bt * N

    def pad_row(a):
        return jnp.pad(a.astype(f32).reshape(1, dim), ((0, 0), (0, pad)))

    def pad_mat_T(w):  # (dim, dim) weight -> zero-padded transposed (dim_p, dim_p)
        return jnp.pad(w.astype(f32).T, ((0, pad), (0, pad)))

    # Batch-invariant query path hoisted out of the kernel (pure JAX, computed once):
    #   q = LN_q(query_token @ Wq^T + bq) * 1/sqrt(head_dim)
    qt = params["query_token"].astype(f32).reshape(1, dim)
    q = qt @ params["wq"].astype(f32).T + params["bq"].astype(f32)
    mu = jnp.mean(q, axis=-1, keepdims=True)
    var = jnp.mean((q - mu) ** 2, axis=-1, keepdims=True)
    q = (q - mu) * jax.lax.rsqrt(var + eps) * params["qn_w"].astype(f32) \
        + params["qn_b"].astype(f32)
    q = q * (1.0 / math.sqrt(head_dim))
    q = jnp.pad(q, ((0, 0), (0, pad)))                               # (1, dim_p)

    # Fused, transposed, zero-padded k/v weight; bf16 MXU operands.
    wkvT = jnp.concatenate([pad_mat_T(params["wk"]), pad_mat_T(params["wv"])],
                           axis=1).astype(jnp.bfloat16)              # (dim_p, 2*dim_p)
    bkv = jnp.concatenate([pad_row(params["bk"]), pad_row(params["bv"])], axis=1)
    woT = pad_mat_T(params["wo"]).astype(jnp.bfloat16)               # (dim_p, dim_p)
    bo = pad_row(params["bo"])

    # Head one-hot mask and its pre-transposed form; zero on padded lanes.
    d_idx = jnp.arange(dim_p)
    head_of_d = jnp.where(d_idx < dim, d_idx // head_dim, num_heads)
    hm = (head_of_d[None, :] == jnp.arange(num_heads)[:, None]).astype(f32)  # (H, dim_p)
    hmT = hm.T                                                                # (dim_p, H)
    lane_mask = (d_idx < dim).astype(f32).reshape(1, dim_p)

    x_p = jnp.pad(x.astype(f32), ((0, 0), (0, 0), (0, pad))).reshape(nb, rows, dim_p)

    inputs = (
        x_p, q,
        pad_row(params["norm_w"]), pad_row(params["norm_b"]),
        wkvT, bkv, woT, bo,
        pad_row(params["kn_w"]), pad_row(params["kn_b"]),
        hm, hmT, lane_mask,
    )

    in_specs = [pl.BlockSpec((1, rows, dim_p), lambda i: (i, 0, 0))] + [
        pl.BlockSpec(a.shape, lambda i: (0, 0)) for a in inputs[1:]
    ]

    kernel = functools.partial(
        _cross_attn_kernel, eps=eps, inv_dim=1.0 / dim, bt=bt, n=N, dim_p=dim_p)

    out = pl.pallas_call(
        kernel,
        out_shape=jax.ShapeDtypeStruct((nb, bt, dim_p), f32),
        grid_spec=pltpu.PrefetchScalarGridSpec(
            num_scalar_prefetch=0,
            grid=(nb,),
            in_specs=in_specs,
            out_specs=pl.BlockSpec((1, bt, dim_p), lambda i: (i, 0, 0)),
        ),
        compiler_params=pltpu.CompilerParams(
            dimension_semantics=("parallel",),
            # Weights use a constant index_map; at realistic dim the default scoped
            # VMEM is enough here since they're bf16.  Raise vmem_limit_bytes if a
            # larger Bt / dim configuration is used on v7x (64 MiB physical VMEM).
        ),
    )(*inputs)

    return out.reshape(B, dim_p)[:, :dim].reshape(B, 1, dim).astype(x.dtype)


def _reference(x, params, *, num_heads, eps=1e-6):
    # Pure-JAX reference mirroring the PyTorch forward.
    B, N, dim = x.shape
    head_dim = dim // num_heads

    def ln(t, w, b):
        mu = jnp.mean(t, axis=-1, keepdims=True)
        var = jnp.mean((t - mu) ** 2, axis=-1, keepdims=True)
        return (t - mu) / jnp.sqrt(var + eps) * w + b

    query = jnp.broadcast_to(params["query_token"], (B, 1, dim))
    x_norm = ln(x, params["norm_w"], params["norm_b"])
    q = query @ params["wq"].T + params["bq"]
    k = x_norm @ params["wk"].T + params["bk"]
    v = x_norm @ params["wv"].T + params["bv"]
    q = ln(q, params["qn_w"], params["qn_b"])
    k = ln(k, params["kn_w"], params["kn_b"])

    q = q.reshape(B, 1, num_heads, head_dim).transpose(0, 2, 1, 3)
    k = k.reshape(B, N, num_heads, head_dim).transpose(0, 2, 1, 3)
    v = v.reshape(B, N, num_heads, head_dim).transpose(0, 2, 1, 3)

    attn = jnp.einsum("bhqd,bhkd->bhqk", q, k) / math.sqrt(head_dim)
    attn = jax.nn.softmax(attn, axis=-1)
    out = jnp.einsum("bhqk,bhkd->bhqd", attn, v)
    out = out.transpose(0, 2, 1, 3).reshape(B, 1, dim)
    return out @ params["wo"].T + params["bo"]


def _init_params(key, dim):
    ks = jax.random.split(key, 16)
    unif = lambda k, shape: jax.random.uniform(
        k, shape, jnp.float32, -1.0 / math.sqrt(dim), 1.0 / math.sqrt(dim))
    return {
        "query_token": jax.random.normal(ks[0], (1, 1, dim), jnp.float32) / math.sqrt(dim),
        "norm_w": jax.random.normal(ks[1], (dim,), jnp.float32) * 0.1 + 1.0,
        "norm_b": jax.random.normal(ks[2], (dim,), jnp.float32) * 0.1,
        "wq": unif(ks[3], (dim, dim)), "bq": unif(ks[4], (dim,)),
        "wk": unif(ks[5], (dim, dim)), "bk": unif(ks[6], (dim,)),
        "wv": unif(ks[7], (dim, dim)), "bv": unif(ks[8], (dim,)),
        "wo": unif(ks[9], (dim, dim)), "bo": unif(ks[10], (dim,)),
        "qn_w": jax.random.normal(ks[11], (dim,), jnp.float32) * 0.1 + 1.0,
        "qn_b": jax.random.normal(ks[12], (dim,), jnp.float32) * 0.1,
        "kn_w": jax.random.normal(ks[13], (dim,), jnp.float32) * 0.1 + 1.0,
        "kn_b": jax.random.normal(ks[14], (dim,), jnp.float32) * 0.1,
    }


if __name__ == "__main__":
    B, N, dim, num_heads = 2, 16, 32, 4

    key = jax.random.PRNGKey(0)
    k_x, k_p = jax.random.split(key)
    x = jax.random.normal(k_x, (B, N, dim), jnp.float32)
    params = _init_params(k_p, dim)

    out = discriminator_cross_attn_block(x, params, num_heads=num_heads)
    out = jax.block_until_ready(out)

    ref = _reference(x, params, num_heads=num_heads)
    assert out.shape == (B, 1, dim)
    # bf16 MXU operands + approx reciprocal -> looser tolerance than pure f32.
    assert jnp.allclose(out, ref, atol=3e-2, rtol=3e-2), "mismatch vs reference"

    print("KERNEL_OK")
</pallas_src>

<mosaic_0001>
module attributes {stable_mosaic.version = 11 : i64} {
  func.func @_cross_attn_kernel(%arg0: i32, %arg1: memref<1x16x128xf32, #tpu.memory_space<vmem>>, %arg2: memref<1x128xf32, #tpu.memory_space<vmem>>, %arg3: memref<1x128xf32, #tpu.memory_space<vmem>>, %arg4: memref<1x128xf32, #tpu.memory_space<vmem>>, %arg5: memref<128x256xbf16, #tpu.memory_space<vmem>>, %arg6: memref<1x256xf32, #tpu.memory_space<vmem>>, %arg7: memref<128x128xbf16, #tpu.memory_space<vmem>>, %arg8: memref<1x128xf32, #tpu.memory_space<vmem>>, %arg9: memref<1x128xf32, #tpu.memory_space<vmem>>, %arg10: memref<1x128xf32, #tpu.memory_space<vmem>>, %arg11: memref<4x128xf32, #tpu.memory_space<vmem>>, %arg12: memref<128x4xf32, #tpu.memory_space<vmem>>, %arg13: memref<1x128xf32, #tpu.memory_space<vmem>>, %arg14: memref<1x1x128xf32, #tpu.memory_space<vmem>>) attributes {dimension_semantics = [#tpu.dimension_semantics<parallel>], iteration_bounds = array<i64: 2>, scalar_prefetch = 0 : i64, scratch_operands = 0 : i64, tpu.core_type = #tpu.core_type<tc>, window_params = [{transform_indices = @transform_0, window_bounds = array<i64: 1, 16, 128>}, {pipeline_mode = #tpu.pipeline_mode<synchronous>, transform_indices = @transform_1, window_bounds = array<i64: 1, 128>}, {pipeline_mode = #tpu.pipeline_mode<synchronous>, transform_indices = @transform_2, window_bounds = array<i64: 1, 128>}, {pipeline_mode = #tpu.pipeline_mode<synchronous>, transform_indices = @transform_3, window_bounds = array<i64: 1, 128>}, {pipeline_mode = #tpu.pipeline_mode<synchronous>, transform_indices = @transform_4, window_bounds = array<i64: 128, 256>}, {pipeline_mode = #tpu.pipeline_mode<synchronous>, transform_indices = @transform_5, window_bounds = array<i64: 1, 256>}, {pipeline_mode = #tpu.pipeline_mode<synchronous>, transform_indices = @transform_6, window_bounds = array<i64: 128, 128>}, {pipeline_mode = #tpu.pipeline_mode<synchronous>, transform_indices = @transform_7, window_bounds = array<i64: 1, 128>}, {pipeline_mode = #tpu.pipeline_mode<synchronous>, transform_indices = @transform_8, window_bounds = array<i64: 1, 128>}, {pipeline_mode = #tpu.pipeline_mode<synchronous>, transform_indices = @transform_9, window_bounds = array<i64: 1, 128>}, {pipeline_mode = #tpu.pipeline_mode<synchronous>, transform_indices = @transform_10, window_bounds = array<i64: 4, 128>}, {pipeline_mode = #tpu.pipeline_mode<synchronous>, transform_indices = @transform_11, window_bounds = array<i64: 128, 4>}, {pipeline_mode = #tpu.pipeline_mode<synchronous>, transform_indices = @transform_12, window_bounds = array<i64: 1, 128>}, {transform_indices = @transform_13, window_bounds = array<i64: 1, 1, 128>}]} {
    %c0 = arith.constant 0 : index
    %c0_0 = arith.constant 0 : index
    %0 = vector.load %arg13[%c0, %c0_0] : memref<1x128xf32, #tpu.memory_space<vmem>>, vector<1x128xf32>
    %c0_1 = arith.constant 0 : index
    %c0_2 = arith.constant 0 : index
    %c0_3 = arith.constant 0 : index
    %1 = vector.load %arg1[%c0_1, %c0_2, %c0_3] : memref<1x16x128xf32, #tpu.memory_space<vmem>>, vector<1x16x128xf32>
    %2 = vector.shape_cast %1 : vector<1x16x128xf32> to vector<16x128xf32>
    %c0_4 = arith.constant 0 : index
    %c0_5 = arith.constant 0 : index
    %3 = vector.load %arg3[%c0_4, %c0_5] : memref<1x128xf32, #tpu.memory_space<vmem>>, vector<1x128xf32>
    %c0_6 = arith.constant 0 : index
    %c0_7 = arith.constant 0 : index
    %4 = vector.load %arg4[%c0_6, %c0_7] : memref<1x128xf32, #tpu.memory_space<vmem>>, vector<1x128xf32>
    %cst = arith.constant dense<0.000000e+00> : vector<16xf32>
    %5 = vector.multi_reduction <add>, %2, %cst [1] : vector<16x128xf32> to vector<16xf32>
    %6 = vector.shape_cast %5 : vector<16xf32> to vector<16x1xf32>
    %cst_8 = arith.constant 3.125000e-02 : f32
    %7 = vector.broadcast %cst_8 : f32 to vector<16x1xf32>
    %8 = arith.mulf %6, %7 : vector<16x1xf32>
    %9 = vector.broadcast %8 : vector<16x1xf32> to vector<16x128xf32>
    %10 = arith.subf %2, %9 : vector<16x128xf32>
    %11 = vector.broadcast %0 : vector<1x128xf32> to vector<16x128xf32>
    %12 = arith.mulf %10, %11 : vector<16x128xf32>
    %13 = arith.mulf %12, %12 : vector<16x128xf32>
    %cst_9 = arith.constant dense<0.000000e+00> : vector<16xf32>
    %14 = vector.multi_reduction <add>, %13, %cst_9 [1] : vector<16x128xf32> to vector<16xf32>
    %15 = vector.shape_cast %14 : vector<16xf32> to vector<16x1xf32>
    %cst_10 = arith.constant 3.125000e-02 : f32
    %16 = vector.broadcast %cst_10 : f32 to vector<16x1xf32>
    %17 = arith.mulf %15, %16 : vector<16x1xf32>
    %cst_11 = arith.constant 9.99999997E-7 : f32
    %18 = vector.broadcast %cst_11 : f32 to vector<16x1xf32>
    %19 = arith.addf %17, %18 : vector<16x1xf32>
    %20 = math.rsqrt %19 : vector<16x1xf32>
    %21 = vector.broadcast %20 : vector<16x1xf32> to vector<16x128xf32>
    %22 = arith.mulf %12, %21 : vector<16x128xf32>
    %23 = vector.broadcast %3 : vector<1x128xf32> to vector<16x128xf32>
    %24 = arith.mulf %22, %23 : vector<16x128xf32>
    %25 = vector.broadcast %4 : vector<1x128xf32> to vector<16x128xf32>
    %26 = arith.addf %24, %25 : vector<16x128xf32>
    %27 = arith.truncf %26 : vector<16x128xf32> to vector<16x128xbf16>
    %c0_12 = arith.constant 0 : index
    %c0_13 = arith.constant 0 : index
    %28 = vector.load %arg5[%c0_12, %c0_13] : memref<128x256xbf16, #tpu.memory_space<vmem>>, vector<128x256xbf16>
    %cst_14 = arith.constant dense<0.000000e+00> : vector<16x256xf32>
    %29 = tpu.matmul %27, %28, %cst_14 {dimension_numbers = #tpu.dot_dimension_numbers<[1], [0], [0], [1], [0, 0, 1, 1], [], []>} : vector<16x128xbf16>, vector<128x256xbf16>, vector<16x256xf32> -> vector<16x256xf32>
    %c0_15 = arith.constant 0 : index
    %c0_16 = arith.constant 0 : index
    %30 = vector.load %arg6[%c0_15, %c0_16] : memref<1x256xf32, #tpu.memory_space<vmem>>, vector<1x256xf32>
    %31 = vector.broadcast %30 : vector<1x256xf32> to vector<16x256xf32>
    %32 = arith.addf %29, %31 : vector<16x256xf32>
    %33 = vector.extract_strided_slice %32 {offsets = [0, 0], sizes = [16, 128], strides = [1, 1]} : vector<16x256xf32> to vector<16x128xf32>
    %34 = vector.extract_strided_slice %32 {offsets = [0, 128], sizes = [16, 128], strides = [1, 1]} : vector<16x256xf32> to vector<16x128xf32>
    %c0_17 = arith.constant 0 : index
    %c0_18 = arith.constant 0 : index
    %35 = vector.load %arg9[%c0_17, %c0_18] : memref<1x128xf32, #tpu.memory_space<vmem>>, vector<1x128xf32>
    %c0_19 = arith.constant 0 : index
    %c0_20 = arith.constant 0 : index
    %36 = vector.load %arg10[%c0_19, %c0_20] : memref<1x128xf32, #tpu.memory_space<vmem>>, vector<1x128xf32>
    %cst_21 = arith.constant dense<0.000000e+00> : vector<16xf32>
    %37 = vector.multi_reduction <add>, %33, %cst_21 [1] : vector<16x128xf32> to vector<16xf32>
    %38 = vector.shape_cast %37 : vector<16xf32> to vector<16x1xf32>
    %cst_22 = arith.constant 3.125000e-02 : f32
    %39 = vector.broadcast %cst_22 : f32 to vector<16x1xf32>
    %40 = arith.mulf %38, %39 : vector<16x1xf32>
    %41 = vector.broadcast %40 : vector<16x1xf32> to vector<16x128xf32>
    %42 = arith.subf %33, %41 : vector<16x128xf32>
    %43 = vector.broadcast %0 : vector<1x128xf32> to vector<16x128xf32>
    %44 = arith.mulf %42, %43 : vector<16x128xf32>
    %45 = arith.mulf %44, %44 : vector<16x128xf32>
    %cst_23 = arith.constant dense<0.000000e+00> : vector<16xf32>
    %46 = vector.multi_reduction <add>, %45, %cst_23 [1] : vector<16x128xf32> to vector<16xf32>
    %47 = vector.shape_cast %46 : vector<16xf32> to vector<16x1xf32>
    %cst_24 = arith.constant 3.125000e-02 : f32
    %48 = vector.broadcast %cst_24 : f32 to vector<16x1xf32>
    %49 = arith.mulf %47, %48 : vector<16x1xf32>
    %cst_25 = arith.constant 9.99999997E-7 : f32
    %50 = vector.broadcast %cst_25 : f32 to vector<16x1xf32>
    %51 = arith.addf %49, %50 : vector<16x1xf32>
    %52 = math.rsqrt %51 : vector<16x1xf32>
    %53 = vector.broadcast %52 : vector<16x1xf32> to vector<16x128xf32>
    %54 = arith.mulf %44, %53 : vector<16x128xf32>
    %55 = vector.broadcast %35 : vector<1x128xf32> to vector<16x128xf32>
    %56 = arith.mulf %54, %55 : vector<16x128xf32>
    %57 = vector.broadcast %36 : vector<1x128xf32> to vector<16x128xf32>
    %58 = arith.addf %56, %57 : vector<16x128xf32>
    %c0_26 = arith.constant 0 : index
    %c0_27 = arith.constant 0 : index
    %59 = vector.load %arg2[%c0_26, %c0_27] : memref<1x128xf32, #tpu.memory_space<vmem>>, vector<1x128xf32>
    %60 = vector.broadcast %59 : vector<1x128xf32> to vector<16x128xf32>
    %61 = arith.mulf %58, %60 : vector<16x128xf32>
    %c0_28 = arith.constant 0 : index
    %c0_29 = arith.constant 0 : index
    %62 = vector.load %arg12[%c0_28, %c0_29] : memref<128x4xf32, #tpu.memory_space<vmem>>, vector<128x4xf32>
    %cst_30 = arith.constant dense<0.000000e+00> : vector<16x4xf32>
    %63 = tpu.matmul %61, %62, %cst_30 {dimension_numbers = #tpu.dot_dimension_numbers<[1], [0], [0], [1], [0, 0, 1, 1], [], []>} : vector<16x128xf32>, vector<128x4xf32>, vector<16x4xf32> -> vector<16x4xf32>
    %64 = vector.shape_cast %63 : vector<16x4xf32> to vector<1x16x4xf32>
    %cst_31 = arith.constant dense<0xFF800000> : vector<1x4xf32>
    %65 = vector.multi_reduction <maximumf>, %64, %cst_31 [1] : vector<1x16x4xf32> to vector<1x4xf32>
    %66 = vector.shape_cast %65 : vector<1x4xf32> to vector<1x1x4xf32>
    %67 = vector.broadcast %66 : vector<1x1x4xf32> to vector<1x16x4xf32>
    %68 = arith.subf %64, %67 : vector<1x16x4xf32>
    %69 = math.exp %68 : vector<1x16x4xf32>
    %cst_32 = arith.constant dense<0.000000e+00> : vector<1x4xf32>
    %70 = vector.multi_reduction <add>, %69, %cst_32 [1] : vector<1x16x4xf32> to vector<1x4xf32>
    %71 = vector.shape_cast %70 : vector<1x4xf32> to vector<1x1x4xf32>
    %72 = tpu.reciprocal %71 {approx = true} : vector<1x1x4xf32> -> vector<1x1x4xf32>
    %73 = vector.broadcast %72 : vector<1x1x4xf32> to vector<1x16x4xf32>
    %74 = arith.mulf %69, %73 : vector<1x16x4xf32>
    %75 = vector.shape_cast %74 : vector<1x16x4xf32> to vector<16x4xf32>
    %c0_33 = arith.constant 0 : index
    %c0_34 = arith.constant 0 : index
    %76 = vector.load %arg11[%c0_33, %c0_34] : memref<4x128xf32, #tpu.memory_space<vmem>>, vector<4x128xf32>
    %cst_35 = arith.constant dense<0.000000e+00> : vector<16x128xf32>
    %77 = tpu.matmul %75, %76, %cst_35 {dimension_numbers = #tpu.dot_dimension_numbers<[1], [0], [0], [1], [0, 0, 1, 1], [], []>} : vector<16x4xf32>, vector<4x128xf32>, vector<16x128xf32> -> vector<16x128xf32>
    %78 = arith.mulf %77, %34 : vector<16x128xf32>
    %79 = vector.shape_cast %78 : vector<16x128xf32> to vector<1x16x128xf32>
    %cst_36 = arith.constant dense<0.000000e+00> : vector<1x128xf32>
    %80 = vector.multi_reduction <add>, %79, %cst_36 [1] : vector<1x16x128xf32> to vector<1x128xf32>
    %81 = arith.truncf %80 : vector<1x128xf32> to vector<1x128xbf16>
    %c0_37 = arith.constant 0 : index
    %c0_38 = arith.constant 0 : index
    %82 = vector.load %arg7[%c0_37, %c0_38] : memref<128x128xbf16, #tpu.memory_space<vmem>>, vector<128x128xbf16>
    %cst_39 = arith.constant dense<0.000000e+00> : vector<1x128xf32>
    %83 = tpu.matmul %81, %82, %cst_39 {dimension_numbers = #tpu.dot_dimension_numbers<[1], [0], [0], [1], [0, 0, 1, 1], [], []>} : vector<1x128xbf16>, vector<128x128xbf16>, vector<1x128xf32> -> vector<1x128xf32>
    %c0_40 = arith.constant 0 : index
    %c0_41 = arith.constant 0 : index
    %84 = vector.load %arg8[%c0_40, %c0_41] : memref<1x128xf32, #tpu.memory_space<vmem>>, vector<1x128xf32>
    %85 = arith.addf %83, %84 : vector<1x128xf32>
    %c0_42 = arith.constant 0 : index
    %c0_43 = arith.constant 0 : index
    %c0_44 = arith.constant 0 : index
    %86 = vector.load %arg14[%c0_42, %c0_43, %c0_44] : memref<1x1x128xf32, #tpu.memory_space<vmem>>, vector<1x1x128xf32>
    %87 = vector.shape_cast %86 : vector<1x1x128xf32> to vector<1x128xf32>
    %88 = vector.shape_cast %85 : vector<1x128xf32> to vector<1x1x128xf32>
    tpu.vector_store %arg14[%c0_42, %c0_43, %c0_44], %88 {strides = array<i32>} : memref<1x1x128xf32, #tpu.memory_space<vmem>>, vector<1x1x128xf32>,
    return
  }
  func.func @transform_0(%arg0: i32) -> (i32, i32, i32) {
    %c0_i32 = arith.constant 0 : i32
    %c0_i32_0 = arith.constant 0 : i32
    %c0_i32_1 = arith.constant 0 : i32
    return %arg0, %c0_i32, %c0_i32_0 : i32, i32, i32
  }
  func.func @transform_1(%arg0: i32) -> (i32, i32) {
    %c0_i32 = arith.constant 0 : i32
    %c0_i32_0 = arith.constant 0 : i32
    %c0_i32_1 = arith.constant 0 : i32
    return %c0_i32, %c0_i32_0 : i32, i32
  }
  func.func @transform_2(%arg0: i32) -> (i32, i32) {
    %c0_i32 = arith.constant 0 : i32
    %c0_i32_0 = arith.constant 0 : i32
    %c0_i32_1 = arith.constant 0 : i32
    return %c0_i32, %c0_i32_0 : i32, i32
  }
  func.func @transform_3(%arg0: i32) -> (i32, i32) {
    %c0_i32 = arith.constant 0 : i32
    %c0_i32_0 = arith.constant 0 : i32
    %c0_i32_1 = arith.constant 0 : i32
    return %c0_i32, %c0_i32_0 : i32, i32
  }
  func.func @transform_4(%arg0: i32) -> (i32, i32) {
    %c0_i32 = arith.constant 0 : i32
    %c0_i32_0 = arith.constant 0 : i32
    %c0_i32_1 = arith.constant 0 : i32
    return %c0_i32, %c0_i32_0 : i32, i32
  }
  func.func @transform_5(%arg0: i32) -> (i32, i32) {
    %c0_i32 = arith.constant 0 : i32
    %c0_i32_0 = arith.constant 0 : i32
    %c0_i32_1 = arith.constant 0 : i32
    return %c0_i32, %c0_i32_0 : i32, i32
  }
  func.func @transform_6(%arg0: i32) -> (i32, i32) {
    %c0_i32 = arith.constant 0 : i32
    %c0_i32_0 = arith.constant 0 : i32
    %c0_i32_1 = arith.constant 0 : i32
    return %c0_i32, %c0_i32_0 : i32, i32
  }
  func.func @transform_7(%arg0: i32) -> (i32, i32) {
    %c0_i32 = arith.constant 0 : i32
    %c0_i32_0 = arith.constant 0 : i32
    %c0_i32_1 = arith.constant 0 : i32
    return %c0_i32, %c0_i32_0 : i32, i32
  }
  func.func @transform_8(%arg0: i32) -> (i32, i32) {
    %c0_i32 = arith.constant 0 : i32
    %c0_i32_0 = arith.constant 0 : i32
    %c0_i32_1 = arith.constant 0 : i32
    return %c0_i32, %c0_i32_0 : i32, i32
  }
  func.func @transform_9(%arg0: i32) -> (i32, i32) {
    %c0_i32 = arith.constant 0 : i32
    %c0_i32_0 = arith.constant 0 : i32
    %c0_i32_1 = arith.constant 0 : i32
    return %c0_i32, %c0_i32_0 : i32, i32
  }
  func.func @transform_10(%arg0: i32) -> (i32, i32) {
    %c0_i32 = arith.constant 0 : i32
    %c0_i32_0 = arith.constant 0 : i32
    %c0_i32_1 = arith.constant 0 : i32
    return %c0_i32, %c0_i32_0 : i32, i32
  }
  func.func @transform_11(%arg0: i32) -> (i32, i32) {
    %c0_i32 = arith.constant 0 : i32
    %c0_i32_0 = arith.constant 0 : i32
    %c0_i32_1 = arith.constant 0 : i32
    return %c0_i32, %c0_i32_0 : i32, i32
  }
  func.func @transform_12(%arg0: i32) -> (i32, i32) {
    %c0_i32 = arith.constant 0 : i32
    %c0_i32_0 = arith.constant 0 : i32
    %c0_i32_1 = arith.constant 0 : i32
    return %c0_i32, %c0_i32_0 : i32, i32
  }
  func.func @transform_13(%arg0: i32) -> (i32, i32, i32) {
    %c0_i32 = arith.constant 0 : i32
    %c0_i32_0 = arith.constant 0 : i32
    %c0_i32_1 = arith.constant 0 : i32
    return %arg0, %c0_i32, %c0_i32_0 : i32, i32, i32
  }
}

</mosaic_0001>

<bundles_post_ra>
// kernel: tpu_custom_call.1
= control target key start
LH: loop header
LB: loop body
LE: loop exit
PB: predicated region body
PF: predicated region fallthrough
CT: control target
= control target key end

     0   :  { %s1976_s0 = inlined_call_operand.hbm [shape: f32[2,16,128], index: 0, kind: input, shape index: {}]   ;;  %s1977_s1 = inlined_call_operand.vmem [shape: f32[1,128], index: 1, kind: input, shape index: {}]   ;;  %s1978_s2 = inlined_call_operand.vmem [shape: f32[1,128], index: 2, kind: input, shape index: {}]   ;;  %s1979_s3 = inlined_call_operand.vmem [shape: f32[1,128], index: 3, kind: input, shape index: {}]   ;;  %s1980_s4 = inlined_call_operand.vmem [shape: bf16[128,256], index: 4, kind: input, shape index: {}]   ;;  %s1981_s5 = inlined_call_operand.vmem [shape: f32[1,256], index: 5, kind: input, shape index: {}]   ;;  %s1982_s6 = inlined_call_operand.hbm [shape: bf16[128,128], index: 6, kind: input, shape index: {}]   ;;  %s1983_s7 = inlined_call_operand.vmem [shape: f32[1,128], index: 7, kind: input, shape index: {}]   ;;  %s1984_s8 = inlined_call_operand.vmem [shape: f32[1,128], index: 8, kind: input, shape index: {}]   ;;  %s1985_s9 = inlined_call_operand.vmem [shape: f32[1,128], index: 9, kind: input, shape index: {}]   ;;  %s1986_s10 = inlined_call_operand.vmem [shape: f32[4,128], index: 10, kind: input, shape index: {}]   ;;  %s1987_s11 = inlined_call_operand.vmem [shape: f32[128,4], index: 11, kind: input, shape index: {}]   ;;  %s1988_s12 = inlined_call_operand.vmem [shape: f32[1,128], index: 12, kind: input, shape index: {}]   ;;  %s1989_s13 = inlined_call_operand.hbm [shape: f32[2,1,128], index: 13, kind: output, shape index: {}]  }
   0x1   :  { %1998 = sst [smem:[#allocation14_spill]] %s1983_s7 }
   0x2   :  { %1999 = sst [smem:[#allocation15_spill]] %s1986_s10 }
   0x3   :  { %2000 = sst [smem:[#allocation16_spill]] %s1989_s13 }
   0x4   :  { %18 = vsyncpa [#allocation3], 0 }
   0x5   :  { %20 = vsyncpa [#allocation3 + $0x1], 0 }
   0x6   :  { %21 = vsyncpa [#allocation6], 0 }
   0x7   :  { %22 = vsyncpa [#allocation4], 0 }
   0x8   :  { %24 = vsyncpa [#allocation4 + $0x1], 0  ;;  %s1627_s25 = smov 0   ;;  %s1629_s26 = smov 0  }
   0x9   :  { %s1631_s27 = smov 0   ;;  %s1633_s28 = smov 0  }
   0xa LB: > { %2001 = sst [smem:[#allocation11_spill]] %s1533_s25  ;;  %s1648_s29 = sadd.s32 4294967295, %s1545_s28   ;;  %s1545_s28 = sphi %s1633_s28, %s2022_s28   ;;  %s1541_s27 = sphi %s1631_s27, %s2025_s27   ;;  %s1537_s26 = sphi %s1629_s26, %s2024_s26   ;;  %s1533_s25 = sphi %s1627_s25, %s2023_s25  }
   0xb   : > { %s1138_s30 = sadd.s32 4294967294, %s1545_s28   ;;  %p50_p0 = scmp.ne.s32.totalorder %s1537_s26, %s1533_s25 }
   0xc   : > { %p1995_p1 = scmp.eq.s32.totalorder %s1648_s29, 0  ;;  %p332_p3 = scmp.eq.s32.totalorder %s1138_s30, 1 }
   0xd   : > { %p1139_p5 = scmp.ge.s32.totalorder %s1545_s28, 1  ;;  %p339_p7 = scmp.lt.s32.totalorder %s1545_s28, 3 }
   0xe   : > { %p1657_p4 = por %p1995_p1, %p50_p0  ;;  %p1662_p6 = por %p332_p3, %p50_p0 }
   0xf   : > { %p1667_p8 = pnand %p1139_p5, %p339_p7  ;;  %s1547_s17 = smov [#allocation5]  }
  0x10   : > { %s2002_s14 = scalar_select %p1657_p4, 1, 0 }
  0x11   : > { %s2003_s15 = scalar_select %p1662_p6, 1, 0 }
  0x12   : > { %s2005_s16 = scalar_select %p1667_p8, 1, 0 }
  0x13   : > { %2004 = sst [smem:[#allocation12_spill]] %s2003_s15  ;;  %s366_s18 = sshll.u32 %s1547_s17, 4  ;;  %s1671_s18 = int_to_ptr.vmem [resolvable:$true] %s366_s18 }
  0x14   : > { %p1315_p9 = pneg %p1667_p8  ;;  %s1683_s20 = sadd.s32 1, %s1545_s28  }
  0x15   : > { %2007 = sst [smem:[#allocation13_spill]] %s1683_s20  ;;  %s37_s21 = sadd.s32 1, %s1541_s27 }
  0x16   : > { %p1678_p11 = pnand %p1315_p9, %p1995_p1  ;;  %s34_s22 = ssub.s32 %s1545_s28, %s1683_s20 }
  0x17   : > { %s1417_s30 = scalar_lea.hbm %s1982_s6, 1024 }
  0x18   : > { %p1418_p12 = scmp.ne.s32.totalorder %s1982_s6, %s1417_s30  ;;  %p1419_p13 = pneg %p1678_p11 }
  0x19   : > { %p1424_p5 = scmp.lt.u32.totalorder %s1417_s30, %s1982_s6 }
  0x1a   : > { %p1420_p0 = pnand %p1419_p13, %p1418_p12 }
  0x1c   : > { %p1421_p3 = pneg %p1420_p0 }
  0x1e   : > { %p1426_p7 = pnand %p1424_p5, %p1421_p3 }
  0x20   : > { %1429 = shalt.err (!%p1426_p7)
}
  0x21   : > { %s1430_s20 = scalar_lea.vmem %s1671_s18, 1024  ;;  %p1438_p2 = scmp.lt.s32.totalorder %s1671_s18, %s1671_s18 }
  0x22   : > { %p1431_p9 = scmp.ne.s32.totalorder %s1671_s18, %s1430_s20  ;;  %p1439_p6 = scmp.lt.s32.totalorder %s1430_s20, %s1430_s20 }
  0x24   : > { %p1433_p10 = pnand %p1431_p9, %p1419_p13  ;;  %p1440_p4 = por %p1439_p6, %p1438_p2 }
  0x26   : > { %p1434_p1 = pneg %p1433_p10 }
  0x28   : > { %p1441_p8 = pnand %p1440_p4, %p1434_p1 }
  0x2a   : > { %1444 = shalt.err (!%p1441_p8)
}
  0x2b   : > { %s1548_s15 = smov 64   ;;  %s1549_s13 = smov 4  }
  0x2c   : > { %1318 = dma.hbm_to_vmem [thread:$0]  (!%p1678_p11), %s1982_s6, 1024, %s1671_s18, [#allocation6], %s1548_s15, %s1548_s15, %s1549_s13  }
  0x2d   : > { %p35_p2 = scmp.eq.s32.totalorder %s34_s22, 0  ;;  %p44_p1 = scmp.ne.s32.totalorder %s1541_s27, %s1537_s26 }
  0x2e   : > { %p45_p4 = scmp.eq.s32.totalorder %s1545_s28, 0  ;;  %p1328_p6 = scmp.lt.s32.totalorder %s1545_s28, 2 }
  0x2f   : > { %s1714_s20 = scalar_select %p35_p2, %s1541_s27, %s37_s21  }
  0x30   : > { %p46_p8 = por %p45_p4, %p44_p1  ;;  %p2008_p10 = scmp.eq.s32.totalorder %s1648_s29, 1 }
  0x31   : > { %s398_s30 = sand.u32 1, %s1541_s27   ;;  %s1184_s17 = sshll.u32 %s1545_s28, 8 }
  0x32   : > { %p1718_p12 = por %p2008_p10, %p44_p1  ;;  %s1142_s7 = sshll.u32 %s398_s30, 4 }
  0x33   : > { %s1727_s25 = scalar_lea.hbm %s1976_s0, %s1184_s17  ;;  %s402_s18 = scalar_lea.vmem [#allocation2], %s1142_s7 }
  0x34   : > { %s409_s21 = sshll.u32 %s402_s18, 4  ;;  %p1729_p11 = pnand %p1328_p6, %p46_p8  ;;  %s1733_s21 = int_to_ptr.vmem [resolvable:$true] %s409_s21 }
  0x35   : > { %s1735_s15 = scalar_lea.sflag [#allocation3], %s398_s30  ;;  %s1445_s13 = scalar_lea.hbm %s1727_s25, 256 }
  0x36   : > { %p1446_p13 = scmp.ne.s32.totalorder %s1727_s25, %s1445_s13  ;;  %p1447_p0 = pneg %p1729_p11 }
  0x37   : > { %s1450_s23 = scalar_lea.hbm %s1976_s0, 512  ;;  %p1451_p7 = scmp.lt.u32.totalorder %s1727_s25, %s1976_s0 }
  0x38   : > { %p1448_p3 = pnand %p1447_p0, %p1446_p13  ;;  %p1452_p9 = scmp.lt.u32.totalorder %s1450_s23, %s1445_s13 }
  0x39   : > { %p1454_p1 = scmp.lt.u32.totalorder %s1445_s13, %s1727_s25 }
  0x3a   : > { %p1449_p5 = pneg %p1448_p3  ;;  %p1453_p2 = por %p1452_p9, %p1451_p7 }
  0x3c   : > { %p1455_p4 = por %p1454_p1, %p1453_p2 }
  0x3e   : > { %p1456_p6 = pnand %p1455_p4, %p1449_p5 }
  0x40   : > { %1459 = shalt.err (!%p1456_p6)
}
  0x41   : > { %s1460_s30 = scalar_lea.vmem %s1733_s21, 256  ;;  %s1550_s18 = smov [#allocation2]  }
  0x42   : > { %p1461_p8 = scmp.ne.s32.totalorder %s1733_s21, %s1460_s30  ;;  %s1465_s7 = sshll.u32 %s1550_s18, 4  ;;  %s1466_s7 = int_to_ptr.vmem [resolvable:$false] %s1465_s7 }
  0x43   : > { %s1467_s10 = scalar_lea.vmem %s1466_s7, 512  ;;  %p1468_p3 = scmp.lt.s32.totalorder %s1733_s21, %s1466_s7 }
  0x44   : > { %p1463_p10 = pnand %p1461_p8, %p1447_p0  ;;  %p1469_p7 = scmp.lt.s32.totalorder %s1467_s10, %s1460_s30 }
  0x46   : > { %p1464_p13 = pneg %p1463_p10  ;;  %p1470_p9 = por %p1469_p7, %p1468_p3 }
  0x48   : > { %p1471_p2 = pnand %p1470_p9, %p1464_p13 }
  0x4a   : > { %1474 = shalt.err (!%p1471_p2)
}
  0x4b   : > { %s1551_s13 = smov 128   ;;  %s1552_s23 = smov 8  }
  0x4c   : > { %1322 = dma.hbm_to_vmem [thread:$0]  (!%p1729_p11), %s1727_s25, 256, %s1733_s21, %s1735_s15, %s1551_s13, %s1551_s13, %s1552_s23  }
  0x4d   : > { %p2011_p0 = scmp.ne.s32.totalorder %s2005_s16, 0 }
  0x4e   : > { %s1766_s17 = sand.u32 (!%p2011_p0), 1, %s1537_s26   ;;  %p2012_p5 = scmp.ne.s32.totalorder (!%p2011_p0), %s2002_s14, 0 }
  0x4f   : > { %421 = sbr.rel (%p2011_p0) target bundleno = 1673 (0x689), region = 72  ;;  %s1146_s19 = sshll.u32 (!%p2011_p0), %s1766_s17, 4 }
  0x50   : > { %s424_s30 = scalar_lea.sflag (!%p2011_p0), [#allocation3], %s1766_s17  ;;  %s427_s18 = scalar_lea.vmem (!%p2011_p0), [#allocation2], %s1146_s19 }
  0x56   : > { %1520 = dma.done.wait (%p2012_p5), %s424_s30, 256  }
  0x57   : > { %1522 = vsyncadd (%p2012_p5), %s424_s30, 4294967040  ;;  %p2013_p1 = scmp.eq.s32.totalorder %s1648_s29, 0 }
  0x59   : > { %1524 = dma.done.wait (%p2013_p1), [#allocation6], 1024   ;;  %p2014_p11 = pmov %p2013_p1 }
  0x5a   : > { %v475_v0 = vld [vmem:[%s427_s18] sm:$0xff]  ;;  %v476_v1 = vld [vmem:[%s427_s18 + $0x8] sm:$0xff]  ;;  %v1553_v24 = vmov 0   ;;  %v544_v47 = vlaneseq  ;;  %s2015_s21 = sld [smem:[#allocation15_spill]]  ;;  %vm854_vm0 = vcmask 1043456   ;;  %vm819_vm1 = vcmask 31744  }
  0x5b   : > { %1526 = vsyncadd (%p2014_p11), [#allocation6], 4294966272  ;;  %479 = vadd.xlane.f32.xlu0 %v475_v0  ;;  %v1371_v2 = vld [vmem:[%s1980_s4 + $0x4] ss:$8 sps:$4 sm:$0xff]   ;;  %v1373_v3 = vld [vmem:[%s1980_s4] ss:$8 sps:$4 sm:$0xff]   ;;  %666 = vmatprep.mubr.bf16.mxu0 %v1553_v24 }
  0x5c   : > { %v1374_v4 = vld [vmem:[%s1980_s4 + $0x14] ss:$8 sps:$4 sm:$0xff]   ;;  %634 = vmatprep.subr.bf16.mxu0 %v1371_v2  ;;  %v1790_v7 = vld [vmem:[%s1988_s12] ss:$0 sm:$0xff]  ;;  %v1376_v16 = vld [vmem:[%s1980_s4 + $0x10] ss:$8 sps:$4 sm:$0xff]  }
  0x5d   : > { %635 = vmatpush1.bf16.msra.mxu0 %v1373_v3  ;;  %v1377_v17 = vld [vmem:[%s1980_s4 + $0x24] ss:$8 sps:$4 sm:$0xff]   ;;  %v1379_v18 = vld [vmem:[%s1980_s4 + $0x20] ss:$8 sps:$4 sm:$0xff]   ;;  %v1380_v19 = vld [vmem:[%s1980_s4 + $0x34] ss:$8 sps:$4 sm:$0xff]  }
  0x5e   : > { %636 = vmatprep.subr.bf16.mxu0 %v1374_v4  ;;  %v1382_v20 = vld [vmem:[%s1980_s4 + $0x30] ss:$8 sps:$4 sm:$0xff]   ;;  %v1383_v21 = vld [vmem:[%s1980_s4 + $0x44] ss:$8 sps:$4 sm:$0xff]   ;;  %v1385_v22 = vld [vmem:[%s1980_s4 + $0x40] ss:$8 sps:$4 sm:$0xff]  }
  0x5f   : > { %481 = vadd.xlane.f32.xlu0 %v476_v1  ;;  %v1386_v23 = vld [vmem:[%s1980_s4 + $0x54] ss:$8 sps:$4 sm:$0xff]   ;;  %v1388_v25 = vld [vmem:[%s1980_s4 + $0x50] ss:$8 sps:$4 sm:$0xff]   ;;  %v1389_v26 = vld [vmem:[%s1980_s4 + $0x64] ss:$8 sps:$4 sm:$0xff]  }
  0x60   : > { %v1391_v27 = vld [vmem:[%s1980_s4 + $0x60] ss:$8 sps:$4 sm:$0xff]   ;;  %v1392_v28 = vld [vmem:[%s1980_s4 + $0x74] ss:$8 sps:$4 sm:$0xff]   ;;  %v1394_v29 = vld [vmem:[%s1980_s4 + $0x70] ss:$8 sps:$4 sm:$0xff]  }
  0x61   : > { %637 = vmatpush1.bf16.msra.mxu0 %v1376_v16  ;;  %v1149_v38 = vld [vmem:[%s1978_s2] ss:$0 sm:$0xff]  ;;  %v1839_v48 = vshrl.u32 %v544_v47, 7  ;;  %v729_v59 = vld [vmem:[%s1987_s11 + $0x8] sm:$0xff]  ;;  %v730_v60 = vld [vmem:[%s1987_s11 + $0x10] sm:$0xff]  ;;  %vm1555_vm2 = vmmov 0  }
  0x62   : > { %638 = vmatprep.subr.bf16.mxu0 %v1377_v17  ;;  %v1150_v42 = vld [vmem:[%s1979_s3] ss:$0 sm:$0xff]  ;;  %v731_v62 = vld [vmem:[%s1987_s11 + $0x18] sm:$0xff]  ;;  %v737_v17 = vld [vmem:[%s1987_s11 + $0x48] sm:$0xff]  ;;  %s2016_s15 = sld [smem:[#allocation14_spill]]  ;;  %s1181_s7 = sshll.u32 %s1648_s29, 4 }
  0x63   : > { %v546_v49 = vsub.s32 0, %v1839_v48  ;;  %v1845_v50 = vld [vmem:[%s1981_s5] sm:$0x3]  ;;  %v1279_v63 = vpack.c.bf16 %v731_v62, %v730_v60  ;;  %s472_s10 = scalar_lea.vmem [#allocation7], %s1766_s17  ;;  %s2017_s30 = sld [smem:[#allocation16_spill]] }
  0x64   : > { %v728_v58 = vld [vmem:[%s1987_s11] sm:$0xff]  ;;  %s1062_s13 = sshll.u32 %s472_s10, 4  ;;  %s1050_s16 = scalar_lea.sflag [#allocation4], %s1766_s17  ;;  %s1934_s13 = int_to_ptr.vmem [resolvable:$true] %s1062_s13 }
  0x65   : > { %639 = vmatpush1.bf16.msra.mxu0 %v1379_v18  ;;  %v547_v51 = vrot.slane %v1845_v50, %v546_v49  ;;  %v1275_v61 = vpack.c.bf16 %v729_v59, %v728_v58  ;;  %v736_v16 = vld [vmem:[%s1987_s11 + $0x40] sm:$0xff]  ;;  %v738_v18 = vld [vmem:[%s1987_s11 + $0x50] sm:$0xff]  ;;  %s1475_s29 = scalar_lea.vmem %s1934_s13, 16  ;;  %s1556_s25 = smov [#allocation7]  }
  0x66   : > { %640 = vmatprep.subr.bf16.mxu0 %v1380_v19  ;;  %v1291_v19 = vpack.c.bf16 %v737_v17, %v736_v16  ;;  %v847_v47 = vld [vmem:[%s2015_s21] sm:$0xf]  ;;  %p1476_p4 = scmp.ne.s32.totalorder %s1934_s13, %s1475_s29  ;;  %s1479_s21 = sshll.u32 %s1556_s25, 4  ;;  %s1480_s21 = int_to_ptr.vmem [resolvable:$false] %s1479_s21 }
  0x67   : > { %1276 = vmatprep.subr.bf16.mxu1 %v1275_v61  ;;  %v1395_v49 = vld [vmem:[#allocation5] sm:$0xff]   ;;  %s1481_s22 = scalar_lea.vmem %s1480_s21, 32  ;;  %p1482_p10 = scmp.lt.s32.totalorder %s1934_s13, %s1480_s21 }
  0x68   : > { %1278 = vmatpush3.bf16.msra.mxu1 %v1275_v61  ;;  %p1477_p6 = pnand %p1476_p4, %p1718_p12  ;;  %p1483_p13 = scmp.lt.s32.totalorder %s1481_s22, %s1475_s29 }
  0x69   : > { %641 = vmatpush1.bf16.msra.mxu0 %v1382_v20  ;;  %1280 = vmatprep.subr.bf16.mxu1 %v1279_v63  ;;  %v739_v20 = vld [vmem:[%s1987_s11 + $0x58] sm:$0xff]  ;;  %s1932_s18 = scalar_lea.hbm %s2017_s30, %s1181_s7 }
  0x6a   : > { %642 = vmatprep.subr.bf16.mxu0 %v1383_v21  ;;  %v1295_v21 = vpack.c.bf16 %v739_v20, %v738_v18  ;;  %p1478_p8 = pneg %p1477_p6  ;;  %p1484_p3 = por %p1483_p13, %p1482_p10 }
  0x6c   : > { %1282 = vmatpush3.bf16.msra.mxu1 %v1279_v63  ;;  %p1485_p7 = pnand %p1484_p3, %p1478_p8 }
  0x6d   : > { %643 = vmatpush1.bf16.msra.mxu0 %v1385_v22  ;;  %v740_v22 = vld [vmem:[%s1987_s11 + $0x60] sm:$0xff] }
  0x6e   : > { %644 = vmatprep.subr.bf16.mxu0 %v1386_v23  ;;  %v741_v23 = vld [vmem:[%s1987_s11 + $0x68] sm:$0xff] }
  0x6f   : > { %v1299_v24 = vpack.c.bf16 %v741_v23, %v740_v22  ;;  %v1399_v22 = vld [vmem:[#allocation5 + $0x20] sm:$0xff]   ;;  %v1400_v23 = vld [vmem:[#allocation5 + $0x28] sm:$0xff]  }
  0x71   : > { %645 = vmatpush1.bf16.msra.mxu0 %v1388_v25  ;;  %v742_v25 = vld [vmem:[%s1987_s11 + $0x70] sm:$0xff] }
  0x72   : > { %646 = vmatprep.subr.bf16.mxu0 %v1389_v26  ;;  %v743_v26 = vld [vmem:[%s1987_s11 + $0x78] sm:$0xff] }
  0x75   : > { %647 = vmatpush1.bf16.msra.mxu0 %v1391_v27  ;;  %v1303_v27 = vpack.c.bf16 %v743_v26, %v742_v25  ;;  %v1402_v25 = vld [vmem:[#allocation5 + $0x38] sm:$0xff]   ;;  %v550_v26 = vsub.s32 1, %v1839_v48 }
  0x76   : > { %648 = vmatprep.subr.bf16.mxu0 %v1392_v28 }
  0x79   : > { %649 = vmatpush1.bf16.msra.mxu0 %v1394_v29 }
  0xe8   : > { %v480_v5 = vpop.xlane.xlu0 %479 }
  0xe9   : > { %v483_v6 = vmul.f32 0.03125, %v480_v5 }
  0xeb   : > { %v485_v8 = vsub.f32 %v475_v0, %v483_v6 }
  0xec   : > { %v482_v9 = vpop.xlane.xlu0 %481 }
  0xed   : > { %v484_v10 = vmul.f32 0.03125, %v482_v9  ;;  %v493_v11 = vmul.f32 %v1790_v7, %v485_v8 }
  0xef   : > { %v486_v12 = vsub.f32 %v476_v1, %v484_v10  ;;  %v495_v13 = vmul.f32 %v493_v11, %v493_v11 }
  0xf1   : > { %497 = vadd.xlane.f32.xlu1 %v495_v13  ;;  %v494_v14 = vmul.f32 %v1790_v7, %v486_v12  ;;  %v733_v12 = vld [vmem:[%s1987_s11 + $0x28] sm:$0xff] }
  0xf3   : > { %v496_v15 = vmul.f32 %v494_v14, %v494_v14 }
  0xf5   : > { %499 = vadd.xlane.f32.xlu1 %v496_v15 }
 0x17e   : > { %v498_v30 = vpop.xlane.xlu1 %497 }
 0x17f   : > { %v501_v31 = vmul.f32 0.03125, %v498_v30 }
 0x181   : > { %v503_v32 = vadd.f32 1e-06, %v501_v31 }
 0x182   : > { %v500_v33 = vpop.xlane.xlu1 %499 }
 0x183   : > { %1403 = vrsqrt.f32 %v503_v32  ;;  %v502_v34 = vmul.f32 0.03125, %v500_v33 }
 0x185   : > { %v504_v35 = vadd.f32 1e-06, %v502_v34 }
 0x187   : > { %1405 = vrsqrt.f32 %v504_v35  ;;  %v1167_v35 = vld [vmem:[%s1984_s8] ss:$0 sm:$0xff] }
 0x18d   : > { %v1404_v36 = vpop.eup %1403 }
 0x18e   : > { %v507_v37 = vmul.f32 %v1404_v36, %v493_v11  ;;  %v732_v11 = vld [vmem:[%s1987_s11 + $0x20] sm:$0xff] }
 0x18f   : > { %v1283_v13 = vpack.c.bf16 %v733_v12, %v732_v11 }
 0x190   : > { %v515_v41 = vmul.f32 %v1149_v38, %v507_v37 }
 0x191   : > { %v1406_v39 = vpop.eup %1405  ;;  %1284 = vmatprep.subr.bf16.mxu1 %v1283_v13 }
 0x192   : > { %v508_v40 = vmul.f32 %v1406_v39, %v494_v14  ;;  %v523_v44 = vadd.f32 %v1150_v42, %v515_v41  ;;  %1286 = vmatpush3.bf16.msra.mxu1 %v1283_v13  ;;  %v734_v14 = vld [vmem:[%s1987_s11 + $0x30] sm:$0xff]  ;;  %v1169_v41 = vld [vmem:[%s1977_s1] ss:$0 sm:$0xff] }
 0x194   : > { %v516_v43 = vmul.f32 %v1149_v38, %v508_v40  ;;  %v1168_v38 = vld [vmem:[%s1985_s9] ss:$0 sm:$0xff] }
 0x196   : > { %v524_v45 = vadd.f32 %v1150_v42, %v516_v43 }
 0x198   : > { %v525_v46 = vpack.c.bf16 %v524_v45, %v523_v44 }
 0x19a   : > { %667 = vmatmul.mubr.bf16.vlgmr.msra.gmra.mrb[0].mxu0 %v525_v46 }
 0x26d   : > { %v668_v52 = vpop.f32.mrb[0].mxu0 }
 0x26e   : > { %v669_v53 = vadd.f32 %v668_v52, %v547_v51  ;;  %v1848_v54 = vpop.f32.mrb[1].mxu0  ;;  %v1396_v52 = vld [vmem:[#allocation5 + $0x8] sm:$0xff]  }
 0x26f   : > { %v672_v55 = vpop.f32.mrb[2].mxu0 }
 0x270   : > { %v673_v56 = vadd.f32 %v672_v55, %v547_v51  ;;  %v1850_v57 = vpop.f32.mrb[3].mxu0  ;;  %679 = vadd.xlane.f32.xlu0 %v669_v53  ;;  %v1554_v51 = vmov 0.0  }
 0x271   : > { %1255 = vmatprep.subr.bf16.mxu0 %v1554_v51  ;;  %1271 = vmatprep.mubr.msk.bf16.mxu0 %vm1555_vm2, %v1554_v51 }
 0x272   : > { %681 = vadd.xlane.f32.xlu1 %v673_v56  ;;  %1256 = vmatpush3.bf16.msra.mxu0 %v1395_v49 }
 0x273   : > { %1257 = vmatprep.subr.bf16.mxu0 %v1554_v51 }
 0x276   : > { %1258 = vmatpush3.bf16.msra.mxu0 %v1396_v52 }
 0x277   : > { %1259 = vmatprep.subr.bf16.mxu0 %v1554_v51 }
 0x2fd   : > { %v680_v0 = vpop.xlane.xlu0 %679 }
 0x2fe   : > { %v683_v1 = vmul.f32 0.03125, %v680_v0 }
 0x2ff   : > { %v682_v2 = vpop.xlane.xlu1 %681 }
 0x300   : > { %v685_v3 = vsub.f32 %v669_v53, %v683_v1  ;;  %v684_v4 = vmul.f32 0.03125, %v682_v2  ;;  %v1397_v53 = vld [vmem:[#allocation5 + $0x10] sm:$0xff]  }
 0x301   : > { %1260 = vmatpush3.bf16.msra.mxu0 %v1397_v53 }
 0x302   : > { %v686_v5 = vsub.f32 %v673_v56, %v684_v4  ;;  %v687_v6 = vmul.f32 %v1790_v7, %v685_v3  ;;  %1261 = vmatprep.subr.bf16.mxu0 %v1554_v51 }
 0x304   : > { %v689_v8 = vmul.f32 %v687_v6, %v687_v6  ;;  %v688_v9 = vmul.f32 %v1790_v7, %v686_v5  ;;  %v735_v7 = vld [vmem:[%s1987_s11 + $0x38] sm:$0xff] }
 0x305   : > { %v1287_v15 = vpack.c.bf16 %v735_v7, %v734_v14 }
 0x306   : > { %691 = vadd.xlane.f32.xlu0 %v689_v8  ;;  %v690_v10 = vmul.f32 %v688_v9, %v688_v9 }
 0x307   : > { %1288 = vmatprep.subr.bf16.mxu1 %v1287_v15 }
 0x308   : > { %693 = vadd.xlane.f32.xlu1 %v690_v10  ;;  %1290 = vmatpush3.bf16.msra.mxu1 %v1287_v15 }
 0x309   : > { %1292 = vmatprep.subr.bf16.mxu1 %v1291_v19 }
 0x30c   : > { %1294 = vmatpush3.bf16.msra.mxu1 %v1291_v19 }
 0x30d   : > { %1296 = vmatprep.subr.bf16.mxu1 %v1295_v21 }
 0x310   : > { %1298 = vmatpush3.bf16.msra.mxu1 %v1295_v21  ;;  %v1398_v21 = vld [vmem:[#allocation5 + $0x18] sm:$0xff]  }
 0x311   : > { %1300 = vmatprep.subr.bf16.mxu1 %v1299_v24  ;;  %1262 = vmatpush3.bf16.msra.mxu0 %v1398_v21 }
 0x312   : > { %1263 = vmatprep.subr.bf16.mxu0 %v1554_v51 }
 0x314   : > { %1302 = vmatpush3.bf16.msra.mxu1 %v1299_v24  ;;  %v1401_v24 = vld [vmem:[#allocation5 + $0x30] sm:$0xff]  }
 0x315   : > { %1304 = vmatprep.subr.bf16.mxu1 %v1303_v27  ;;  %1264 = vmatpush3.bf16.msra.mxu0 %v1399_v22 }
 0x316   : > { %1265 = vmatprep.subr.bf16.mxu0 %v1554_v51 }
 0x318   : > { %1306 = vmatpush3.bf16.msra.mxu1 %v1303_v27  ;;  %v551_v27 = vrot.slane %v1845_v50, %v550_v26  ;;  %v959_v50 = vld [vmem:[%s2016_s15] sm:$0x1] }
 0x319   : > { %1250 = vmatprep.subr.msk.mxu1 %vm854_vm0, %v847_v47  ;;  %1266 = vmatpush3.bf16.msra.mxu0 %v1400_v23 }
 0x31a   : > { %1267 = vmatprep.subr.bf16.mxu0 %v1554_v51 }
 0x31d   : > { %1268 = vmatpush3.bf16.msra.mxu0 %v1401_v24 }
 0x31e   : > { %1269 = vmatprep.subr.bf16.mxu0 %v1554_v51 }
 0x321   : > { %1270 = vmatpush3.bf16.msra.mxu0 %v1402_v25 }
 0x393   : > { %v692_v28 = vpop.xlane.xlu0 %691 }
 0x394   : > { %v695_v29 = vmul.f32 0.03125, %v692_v28  ;;  %v675_v28 = vadd.f32 %v1850_v57, %v551_v27 }
 0x395   : > { %v694_v30 = vpop.xlane.xlu1 %693 }
 0x396   : > { %v697_v31 = vadd.f32 1e-06, %v695_v29  ;;  %v696_v32 = vmul.f32 0.03125, %v694_v30  ;;  %v671_v29 = vadd.f32 %v1848_v54, %v551_v27 }
 0x398   : > { %1407 = vrsqrt.f32 %v697_v31  ;;  %v698_v33 = vadd.f32 1e-06, %v696_v32 }
 0x39a   : > { %1409 = vrsqrt.f32 %v698_v33 }
 0x3a2   : > { %v1408_v34 = vpop.eup %1407 }
 0x3a3   : > { %v701_v36 = vmul.f32 %v1408_v34, %v687_v6 }
 0x3a4   : > { %v1410_v37 = vpop.eup %1409 }
 0x3a5   : > { %v702_v39 = vmul.f32 %v1410_v37, %v688_v9  ;;  %v709_v40 = vmul.f32 %v1167_v35, %v701_v36 }
 0x3a7   : > { %v710_v42 = vmul.f32 %v1167_v35, %v702_v39  ;;  %v717_v43 = vadd.f32 %v1168_v38, %v709_v40 }
 0x3a9   : > { %v718_v44 = vadd.f32 %v1168_v38, %v710_v42  ;;  %v726_v45 = vmul.f32 %v1169_v41, %v717_v43 }
 0x3ab   : > { %v727_v46 = vmul.f32 %v1169_v41, %v718_v44  ;;  %1247 = vmatprep.mubr.f32.mxu1 %v726_v45 }
 0x3ad   : > { %1248 = vmatmul.mubr.f32.vlgmr.msra.gmra.mrb[0].mxu1 %v727_v46 }
 0x3ae   : > { %1251 = vmatpush3.msk.msra.mxu1 %vm854_vm0, %v847_v47 }
 0x480   : > { %v1249_v55 = vpop.f32.mrb[0].mxu1 }
 0x481   : > { %v821_v56 = vsel %vm819_vm1, %v1249_v55, -inf  ;;  %v810_v58 = vpop.f32.mrb[1].mxu1 }
 0x482   : > { %v820_v59 = vsel %vm819_vm1, %v810_v58, -inf }
 0x483   : > { %v822_v60 = vmax.f32 %v820_v59, %v821_v56 }
 0x485   : > { %v823_v61 = vrot.slane %v822_v60, 4 }
 0x487   : > { %v824_v62 = vmax.f32 %v822_v60, %v823_v61 }
 0x489   : > { %v825_v63 = vrot.slane %v824_v62, 2 }
 0x48b   : > { %v826_v0 = vmax.f32 %v824_v62, %v825_v63 }
 0x48d   : > { %v827_v1 = vrot.slane %v826_v0, 1 }
 0x48f   : > { %v828_v2 = vmax.f32 %v826_v0, %v827_v1 }
 0x491   : > { %v829_v3 = vsub.f32 %v810_v58, %v828_v2  ;;  %v830_v4 = vsub.f32 %v1249_v55, %v828_v2 }
 0x493   : > { %v831_v5 = vmul.f32 1.442695, %v829_v3  ;;  %v833_v6 = vmul.f32 1.442695, %v830_v4 }
 0x495   : > { %1411 = vpow2.f32 %v831_v5 }
 0x496   : > { %1413 = vpow2.f32 %v833_v6 }
 0x49f   : > { %v1412_v8 = vpop.eup %1411 }
 0x4a0   : > { %v1414_v9 = vpop.eup %1413  ;;  %v835_v10 = vsel %vm819_vm1, %v1412_v8, 0.0 }
 0x4a1   : > { %v836_v11 = vsel %vm819_vm1, %v1414_v9, 0.0 }
 0x4a2   : > { %v837_v12 = vadd.f32 %v836_v11, %v835_v10 }
 0x4a4   : > { %v838_v13 = vrot.slane %v837_v12, 4 }
 0x4a6   : > { %v839_v14 = vadd.f32 %v838_v13, %v837_v12 }
 0x4a8   : > { %v840_v7 = vrot.slane %v839_v14, 2 }
 0x4aa   : > { %v841_v15 = vadd.f32 %v840_v7, %v839_v14 }
 0x4ac   : > { %v842_v16 = vrot.slane %v841_v15, 1 }
 0x4ae   : > { %v843_v17 = vadd.f32 %v842_v16, %v841_v15 }
 0x4b0   : > { %1415 = vrcp.f32 %v843_v17 }
 0x4ba   : > { %v1416_v18 = vpop.eup %1415 }
 0x4bb   : > { %v845_v19 = vmul.f32 %v1416_v18, %v1412_v8  ;;  %v846_v20 = vmul.f32 %v1416_v18, %v1414_v9 }
 0x4bd   : > { %1252 = vmatprep.mubr.msk.f32.mxu1 %vm819_vm1, %v845_v19 }
 0x4be   : > { %1253 = vmatmul.mubr.msk.f32.vlgmr.msra.gmra.mrb[2].mxu1 %vm819_vm1, %v846_v20 }
 0x591   : > { %v1254_v30 = vpop.f32.mrb[2].mxu1 }
 0x592   : > { %v934_v31 = vmul.f32 %v1254_v30, %v675_v28  ;;  %v924_v32 = vpop.f32.mrb[3].mxu1 }
 0x593   : > { %v933_v33 = vmul.f32 %v924_v32, %v671_v29 }
 0x595   : > { %v935_v34 = vadd.f32 %v934_v31, %v933_v33 }
 0x597   : > { %v936_v35 = vrot.slane %v935_v34, 4 }
 0x599   : > { %v937_v36 = vadd.f32 %v936_v35, %v935_v34 }
 0x59b   : > { %v938_v37 = vrot.slane %v937_v36, 2 }
 0x59d   : > { %v939_v38 = vadd.f32 %v938_v37, %v937_v36 }
 0x59f   : > { %v940_v39 = vrot.slane %v939_v38, 1 }
 0x5a1   : > { %v941_v48 = vadd.f32 %v940_v39, %v939_v38 }
 0x5a3   : > { %v942_v40 = vpack.c.bf16 %v941_v48, %v941_v48 }
 0x5a5   : > { %1272 = vmatmul.mubr.bf16.vlgmr.msra.gmra.mrb[4].mxu0 %v942_v40 }
 0x678   : > { %v1042_v54 = vpop.f32.mrb[4].mxu0 }
 0x679   : > { %v1043_v57 = vadd.f32 %v1042_v54, %v959_v50  ;;  %v1273_v41 = vpop.f32.mrb[5].mxu0 }
 0x67a   : > { %v1045_v42 = vpop.f32.mrb[6].mxu0 }
 0x67b   : > { %1048 = vst [vmem:[%s472_s10] sm:$0x1] %v1043_v57  ;;  %v1274_v43 = vpop.f32.mrb[7].mxu0 }
 0x67c   : > { %1488 = shalt.err (!%p1485_p7)
}
 0x67d   : > { %s1489_s17 = scalar_lea.hbm %s1932_s18, 16  ;;  %s1493_s7 = scalar_lea.hbm %s2017_s30, 32 }
 0x67e   : > { %p1490_p9 = scmp.ne.s32.totalorder %s1932_s18, %s1489_s17  ;;  %p1494_p5 = scmp.lt.u32.totalorder %s1932_s18, %s2017_s30 }
 0x67f   : > { %p1495_p1 = scmp.lt.u32.totalorder %s1493_s7, %s1489_s17  ;;  %p1497_p4 = scmp.lt.u32.totalorder %s1489_s17, %s1932_s18 }
 0x680   : > { %p1491_p2 = pnand %p1490_p9, %p1718_p12 }
 0x681   : > { %p1496_p11 = por %p1495_p1, %p1494_p5 }
 0x682   : > { %p1492_p0 = pneg %p1491_p2 }
 0x683   : > { %p1498_p6 = por %p1497_p4, %p1496_p11 }
 0x685   : > { %p1499_p8 = pnand %p1498_p6, %p1492_p0 }
 0x687   : > { %1502 = shalt.err (!%p1499_p8)
}
 0x688   : > { %1313 = dma.vmem_to_hbm [thread:$0]  (%p1718_p12), %s1934_s13, 16, %s1932_s18, %s1050_s16  }
 0x689 PF: > { %s2018_s19 = sld [smem:[#allocation11_spill]]  ;;  %s2019_s29 = sld [smem:[#allocation12_spill]] }
 0x68a   : > { %p2021_p13 = scmp.ge.s32.totalorder %s1545_s28, 2 }
 0x68f   : > { %s1074_s25 = sand.u32 1, %s2018_s19   ;;  %p2020_p10 = scmp.ne.s32.totalorder %s2019_s29, 0 }
 0x690   : > { %s1075_s21 = scalar_lea.sflag [#allocation4], %s1074_s25 }
 0x691   : > { %p1324_p3 = pnand %p2021_p13, %p2020_p10 }
 0x693   : > { %1528 = dma.done.wait (!%p1324_p3), %s1075_s21, 16  }
 0x694   : > { %1530 = vsyncadd (!%p1324_p3), %s1075_s21, 4294967280  ;;  %s2022_s28 = sld [smem:[#allocation13_spill]]  ;;  %s2023_s25 = smov %s1537_s26 }
 0x695   : > { %s2024_s26 = smov %s1541_s27  ;;  %s2025_s27 = smov %s1714_s20 }
 0x69a   : > { %p27_p7 = scmp.ge.s32.totalorder %s2022_s28, 4  }
 0x69c   :  { %29 = sbr.rel (!%p27_p7) target bundleno = 10 (0xa), region = 121 }
 0x6a3   :  { %1079 = vsyncpa [#allocation3], 1 }
 0x6a4   :  { %1081 = vsyncpa [#allocation3 + $0x1], 1 }
 0x6a5   :  { %1082 = vsyncpa [#allocation6], 1 }
 0x6a6   :  { %1083 = vsyncpa [#allocation4], 1 }
 0x6a7   :  { %1085 = vsyncpa [#allocation4 + $0x1], 1 }

</bundles_post_ra>
